<compile_context>
chip_gen: v7x
topology: tpu7x:2x2x1
jax: 0.10.0
libtpu: 0.0.40
codegen_flags: <defaults>
</compile_context>

<pallas_src>
import functools

import jax
import jax.numpy as jnp
from jax.experimental import pallas as pl
from jax.experimental.pallas import tpu as pltpu


def _num_tensorcores():
    """Best-effort TensorCore count of device 0 (defaults to 1)."""
    try:
        d = jax.devices()[0]
        for attr in ("num_cores", "core_count"):
            v = getattr(d, attr, None)
            if isinstance(v, int) and v > 0:
                return v
    except Exception:
        pass
    return 1


def gru_fused_kernel(gi_ref, whh_ref, bhn_ref, wlin_ref, out_ref, h_hist_ref,
                     *, hidden_size, seq_len):
    """Serial GRU recurrence + fused lin_usage epilogue for one batch tile.

    gi_ref:     (T, bt, 3H)  precomputed x_t @ W_ih^T + (b_ih + [b_hr, b_hz, 0])
    whh_ref:    (H, 3H)      W_hh^T (loop-invariant)
    bhn_ref:    (1, H)       b_hn (the only hidden-side bias needed per step)
    wlin_ref:   (1, H)       lin_usage weight row
    out_ref:    (T, bt, 1)   output: per-step usage predictions (bias added in wrapper)
    h_hist_ref: (T, bt, H)   VMEM scratch: hidden-state history (never hits HBM)
    """
    H = hidden_size
    bt = gi_ref.shape[1]

    # Loop-invariant operands: load / broadcast ONCE before the time loop.
    whh = whh_ref[...]                                     # (H, 3H)
    bhn_b = jnp.broadcast_to(bhn_ref[...], (bt, H))        # hoisted broadcast

    def step(t, h):
        gi_t = gi_ref[t]                                   # (bt, 3H)
        gh = jnp.dot(h, whh, preferred_element_type=jnp.float32)   # (bt, 3H)
        # One fused sigmoid over the 2H-wide (r, z) slab -> single EUP push.
        rz = jax.nn.sigmoid(gi_t[:, :2 * H] + gh[:, :2 * H])
        r = rz[:, :H]
        z = rz[:, H:]
        n = jnp.tanh(gi_t[:, 2 * H:] + r * (gh[:, 2 * H:] + bhn_b))
        h_new = (1.0 - z) * n + z * h
        h_hist_ref[t] = h_new                              # VMEM scratch store
        return h_new

    if seq_len % 8 == 0:
        unroll = 8
    elif seq_len % 4 == 0:
        unroll = 4
    elif seq_len % 2 == 0:
        unroll = 2
    else:
        unroll = 1

    h0 = jnp.zeros((bt, H), jnp.float32)                   # torch.zeros h0
    jax.lax.fori_loop(0, seq_len, step, h0, unroll=unroll)

    # Fused lin_usage epilogue on the VMEM-resident history: one pass,
    # no HBM writeback/readback of the (T, bt, H) history.
    hh = h_hist_ref[...]                                   # (T, bt, H)
    w3 = wlin_ref[...].reshape(1, 1, H)                    # (1, 1, H)
    out_ref[...] = jnp.sum(hh * w3, axis=-1, keepdims=True)  # (T, bt, 1)


@functools.partial(jax.jit, static_argnames=("pred_type", "pred_length"))
def smodel_forward(x, params, pred_type, pred_length):
    """x: (B, T, D) float32. Returns preds (B, T, 1) or (B, pred_length, 1)."""
    B, T, D = x.shape
    H = params["whh_t"].shape[0]

    # Fold b_hr, b_hz into the input-side bias (only b_hn must stay per-step).
    bih_fold = params["bih"].at[:, :2 * H].add(params["bhh"][:, :2 * H])   # (1, 3H)
    bhn = params["bhh"][:, 2 * H:]                                         # (1, H)

    # Input projection hoisted out of the recurrence, produced directly in
    # (T, B, 3H): transpose the D-wide x, NOT the 3H-wide gi.
    xt = jnp.transpose(x, (1, 0, 2)).reshape(T * B, D)                     # (T*B, D)
    gi = (xt @ params["wih_t"] + bih_fold).reshape(T, B, 3 * H)            # (T, B, 3H)

    wlin_row = params["wlin_t"].reshape(1, H)                              # (1, H)

    # Batch tiling gated on TensorCore count: split only if >1 TC AND each
    # tile stays 8-sublane aligned (single-TC chips keep one grid step).
    num_cores = _num_tensorcores()
    nb = 2 if (num_cores >= 2 and B % 2 == 0 and (B // 2) % 8 == 0) else 1
    bt = B // nb

    # Explicit VMEM budget from the tile footprint (double-buffered inputs +
    # scratch history), floored at 32 MiB and capped at v7x's 64 MiB.
    tile_bytes = (2 * (T * bt * 3 * H + H * 3 * H + 2 * H + T * bt) +
                  T * bt * H) * 4
    vmem_limit = min(64 * 1024 * 1024, max(2 * tile_bytes, 32 * 1024 * 1024))

    kernel = functools.partial(gru_fused_kernel, hidden_size=H, seq_len=T)

    preds_tb1 = pl.pallas_call(
        kernel,
        out_shape=jax.ShapeDtypeStruct((T, B, 1), jnp.float32),
        grid_spec=pltpu.PrefetchScalarGridSpec(
            num_scalar_prefetch=0,
            grid=(nb,),                                            # batch tiles only
            in_specs=[
                pl.BlockSpec((T, bt, 3 * H), lambda b: (0, b, 0)),  # gi (precomputed)
                pl.BlockSpec((H, 3 * H), lambda b: (0, 0)),         # W_hh^T
                pl.BlockSpec((1, H), lambda b: (0, 0)),             # b_hn
                pl.BlockSpec((1, H), lambda b: (0, 0)),             # lin_usage weight
            ],
            out_specs=pl.BlockSpec((T, bt, 1), lambda b: (0, b, 0)),
            scratch_shapes=[pltpu.VMEM((T, bt, H), jnp.float32)],   # hidden history
        ),
        compiler_params=pltpu.CompilerParams(
            dimension_semantics=("parallel",),
            vmem_limit_bytes=vmem_limit),
    )(gi, params["whh_t"], bhn, wlin_row)

    preds = jnp.transpose(preds_tb1, (1, 0, 2)) + params["blin"]   # (B, T, 1)
    if pred_type == "partial":
        preds = preds[:, T - pred_length:, :]
    return preds


# ---------------- deterministic parameter init (mirrors SModel.init) -----------

def _orthogonal(key, rows, cols):
    """Semi-orthogonal matrix of shape (rows, cols), gain=1 (like init.orthogonal_)."""
    n = max(rows, cols)
    a = jax.random.normal(key, (n, n), dtype=jnp.float32)
    q, r = jnp.linalg.qr(a)
    q = q * jnp.sign(jnp.diag(r))[None, :]
    return q[:rows, :cols]


def make_params(key, input_size, hidden_size):
    k1, k2, k3 = jax.random.split(key, 3)
    D, H = input_size, hidden_size
    w_ih = _orthogonal(k1, 3 * H, D)     # GRUCell weight_ih: (3H, D), orthogonal
    w_hh = _orthogonal(k2, 3 * H, H)     # GRUCell weight_hh: (3H, H), orthogonal
    b_ih = jnp.zeros((3 * H,), jnp.float32)   # biases -> 0.0
    b_hh = jnp.zeros((3 * H,), jnp.float32)
    w_lin = _orthogonal(k3, 1, H)        # lin_usage.weight: (1, H), orthogonal
    b_lin = jnp.zeros((1,), jnp.float32)
    return {
        "wih_t": w_ih.T,                     # (D, 3H)
        "whh_t": w_hh.T,                     # (H, 3H)
        "bih": b_ih.reshape(1, 3 * H),
        "bhh": b_hh.reshape(1, 3 * H),
        "wlin_t": w_lin.T,                   # (H, 1)
        "blin": b_lin.reshape(1, 1),
    }


# ---------------- pure-JAX reference (for correctness check) -------------------

def smodel_ref(x, params, pred_type, pred_length):
    B, T, D = x.shape
    H = params["whh_t"].shape[0]

    def step(h, x_t):
        gi = x_t @ params["wih_t"] + params["bih"]
        gh = h @ params["whh_t"] + params["bhh"]
        i_r, i_z, i_n = gi[:, :H], gi[:, H:2 * H], gi[:, 2 * H:]
        h_r, h_z, h_n = gh[:, :H], gh[:, H:2 * H], gh[:, 2 * H:]
        r = jax.nn.sigmoid(i_r + h_r)
        z = jax.nn.sigmoid(i_z + h_z)
        n = jnp.tanh(i_n + r * h_n)
        h_new = (1.0 - z) * n + z * h
        pred = h_new @ params["wlin_t"] + params["blin"]
        return h_new, pred

    h0 = jnp.zeros((B, H), jnp.float32)
    _, preds = jax.lax.scan(step, h0, jnp.transpose(x, (1, 0, 2)))
    preds = jnp.transpose(preds, (1, 0, 2))      # (B, T, 1)
    if pred_type == "partial":
        preds = preds[:, T - pred_length:, :]
    return preds


if __name__ == "__main__":
    B, T, D, H = 8, 8, 16, 32
    key = jax.random.PRNGKey(0)
    kx, kp = jax.random.split(key)
    x = jax.random.normal(kx, (B, T, D), dtype=jnp.float32)
    params = make_params(kp, input_size=D, hidden_size=H)

    # pred_type='full'
    out_full = jax.block_until_ready(
        smodel_forward(x, params, pred_type="full", pred_length=T))
    ref_full = smodel_ref(x, params, "full", T)
    assert out_full.shape == (B, T, 1)
    assert jnp.allclose(out_full, ref_full, atol=1e-4, rtol=1e-4)

    # pred_type='partial', pred_length=4
    out_part = jax.block_until_ready(
        smodel_forward(x, params, pred_type="partial", pred_length=4))
    ref_part = smodel_ref(x, params, "partial", 4)
    assert out_part.shape == (B, 4, 1)
    assert jnp.allclose(out_part, ref_part, atol=1e-4, rtol=1e-4)

    print("KERNEL_OK")
</pallas_src>

<mosaic_0001>
module attributes {stable_mosaic.version = 11 : i64} {
  func.func @gru_fused_kernel(%arg0: i32, %arg1: memref<8x8x96xf32, #tpu.memory_space<vmem>>, %arg2: memref<32x96xf32, #tpu.memory_space<vmem>>, %arg3: memref<1x32xf32, #tpu.memory_space<vmem>>, %arg4: memref<1x32xf32, #tpu.memory_space<vmem>>, %arg5: memref<8x8x1xf32, #tpu.memory_space<vmem>>, %arg6: memref<8x8x32xf32, #tpu.memory_space<vmem>>) attributes {dimension_semantics = [#tpu.dimension_semantics<parallel>], iteration_bounds = array<i64: 1>, scalar_prefetch = 0 : i64, scratch_operands = 1 : i64, tpu.core_type = #tpu.core_type<tc>, window_params = [{transform_indices = @transform_0, window_bounds = array<i64: 8, 8, 96>}, {pipeline_mode = #tpu.pipeline_mode<synchronous>, transform_indices = @transform_1, window_bounds = array<i64: 32, 96>}, {pipeline_mode = #tpu.pipeline_mode<synchronous>, transform_indices = @transform_2, window_bounds = array<i64: 1, 32>}, {pipeline_mode = #tpu.pipeline_mode<synchronous>, transform_indices = @transform_3, window_bounds = array<i64: 1, 32>}, {transform_indices = @transform_4, window_bounds = array<i64: 8, 8, 1>}]} {
    %c0 = arith.constant 0 : index
    %c0_0 = arith.constant 0 : index
    %0 = vector.load %arg2[%c0, %c0_0] : memref<32x96xf32, #tpu.memory_space<vmem>>, vector<32x96xf32>
    %c0_1 = arith.constant 0 : index
    %c0_2 = arith.constant 0 : index
    %1 = vector.load %arg3[%c0_1, %c0_2] : memref<1x32xf32, #tpu.memory_space<vmem>>, vector<1x32xf32>
    %2 = vector.shape_cast %1 : vector<1x32xf32> to vector<1x32xf32>
    %3 = vector.broadcast %2 : vector<1x32xf32> to vector<8x32xf32>
    %cst = arith.constant 0.000000e+00 : f32
    %4 = vector.broadcast %cst : f32 to vector<8x32xf32>
    %c0_i32 = arith.constant 0 : i32
    %5 = arith.index_cast %c0_i32 : i32 to index
    %c0_3 = arith.constant 0 : index
    %c0_4 = arith.constant 0 : index
    %6 = vector.load %arg1[%5, %c0_3, %c0_4] : memref<8x8x96xf32, #tpu.memory_space<vmem>>, vector<1x8x96xf32>
    %7 = vector.shape_cast %6 : vector<1x8x96xf32> to vector<8x96xf32>
    %cst_5 = arith.constant dense<0.000000e+00> : vector<8x96xf32>
    %8 = tpu.matmul %4, %0, %cst_5 {dimension_numbers = #tpu.dot_dimension_numbers<[1], [0], [0], [1], [0, 0, 1, 1], [], []>} : vector<8x32xf32>, vector<32x96xf32>, vector<8x96xf32> -> vector<8x96xf32>
    %9 = vector.extract_strided_slice %7 {offsets = [0, 0], sizes = [8, 64], strides = [1, 1]} : vector<8x96xf32> to vector<8x64xf32>
    %10 = vector.extract_strided_slice %8 {offsets = [0, 0], sizes = [8, 64], strides = [1, 1]} : vector<8x96xf32> to vector<8x64xf32>
    %11 = arith.addf %9, %10 : vector<8x64xf32>
    %12 = arith.negf %11 : vector<8x64xf32>
    %13 = math.exp %12 : vector<8x64xf32>
    %cst_6 = arith.constant 1.000000e+00 : f32
    %14 = vector.broadcast %cst_6 : f32 to vector<8x64xf32>
    %15 = arith.addf %14, %13 : vector<8x64xf32>
    %16 = arith.divf %14, %15 : vector<8x64xf32>
    %17 = vector.extract_strided_slice %16 {offsets = [0, 0], sizes = [8, 32], strides = [1, 1]} : vector<8x64xf32> to vector<8x32xf32>
    %18 = vector.extract_strided_slice %16 {offsets = [0, 32], sizes = [8, 32], strides = [1, 1]} : vector<8x64xf32> to vector<8x32xf32>
    %19 = vector.extract_strided_slice %7 {offsets = [0, 64], sizes = [8, 32], strides = [1, 1]} : vector<8x96xf32> to vector<8x32xf32>
    %20 = vector.extract_strided_slice %8 {offsets = [0, 64], sizes = [8, 32], strides = [1, 1]} : vector<8x96xf32> to vector<8x32xf32>
    %21 = arith.addf %20, %3 : vector<8x32xf32>
    %22 = arith.mulf %17, %21 : vector<8x32xf32>
    %23 = arith.addf %19, %22 : vector<8x32xf32>
    %24 = math.tanh %23 : vector<8x32xf32>
    %cst_7 = arith.constant 1.000000e+00 : f32
    %25 = vector.broadcast %cst_7 : f32 to vector<8x32xf32>
    %26 = arith.subf %25, %18 : vector<8x32xf32>
    %27 = arith.mulf %26, %24 : vector<8x32xf32>
    %28 = arith.mulf %18, %4 : vector<8x32xf32>
    %29 = arith.addf %27, %28 : vector<8x32xf32>
    %30 = arith.index_cast %c0_i32 : i32 to index
    %c0_8 = arith.constant 0 : index
    %c0_9 = arith.constant 0 : index
    %31 = vector.load %arg6[%30, %c0_8, %c0_9] : memref<8x8x32xf32, #tpu.memory_space<vmem>>, vector<1x8x32xf32>
    %32 = vector.shape_cast %31 : vector<1x8x32xf32> to vector<8x32xf32>
    %33 = vector.shape_cast %29 : vector<8x32xf32> to vector<1x8x32xf32>
    tpu.vector_store %arg6[%30, %c0_8, %c0_9], %33 {strides = array<i32>} : memref<8x8x32xf32, #tpu.memory_space<vmem>>, vector<1x8x32xf32>,
    %c1_i32 = arith.constant 1 : i32
    %34 = arith.index_cast %c1_i32 : i32 to index
    %c0_10 = arith.constant 0 : index
    %c0_11 = arith.constant 0 : index
    %35 = vector.load %arg1[%34, %c0_10, %c0_11] : memref<8x8x96xf32, #tpu.memory_space<vmem>>, vector<1x8x96xf32>
    %36 = vector.shape_cast %35 : vector<1x8x96xf32> to vector<8x96xf32>
    %cst_12 = arith.constant dense<0.000000e+00> : vector<8x96xf32>
    %37 = tpu.matmul %29, %0, %cst_12 {dimension_numbers = #tpu.dot_dimension_numbers<[1], [0], [0], [1], [0, 0, 1, 1], [], []>} : vector<8x32xf32>, vector<32x96xf32>, vector<8x96xf32> -> vector<8x96xf32>
    %38 = vector.extract_strided_slice %36 {offsets = [0, 0], sizes = [8, 64], strides = [1, 1]} : vector<8x96xf32> to vector<8x64xf32>
    %39 = vector.extract_strided_slice %37 {offsets = [0, 0], sizes = [8, 64], strides = [1, 1]} : vector<8x96xf32> to vector<8x64xf32>
    %40 = arith.addf %38, %39 : vector<8x64xf32>
    %41 = arith.negf %40 : vector<8x64xf32>
    %42 = math.exp %41 : vector<8x64xf32>
    %cst_13 = arith.constant 1.000000e+00 : f32
    %43 = vector.broadcast %cst_13 : f32 to vector<8x64xf32>
    %44 = arith.addf %43, %42 : vector<8x64xf32>
    %45 = arith.divf %43, %44 : vector<8x64xf32>
    %46 = vector.extract_strided_slice %45 {offsets = [0, 0], sizes = [8, 32], strides = [1, 1]} : vector<8x64xf32> to vector<8x32xf32>
    %47 = vector.extract_strided_slice %45 {offsets = [0, 32], sizes = [8, 32], strides = [1, 1]} : vector<8x64xf32> to vector<8x32xf32>
    %48 = vector.extract_strided_slice %36 {offsets = [0, 64], sizes = [8, 32], strides = [1, 1]} : vector<8x96xf32> to vector<8x32xf32>
    %49 = vector.extract_strided_slice %37 {offsets = [0, 64], sizes = [8, 32], strides = [1, 1]} : vector<8x96xf32> to vector<8x32xf32>
    %50 = arith.addf %49, %3 : vector<8x32xf32>
    %51 = arith.mulf %46, %50 : vector<8x32xf32>
    %52 = arith.addf %48, %51 : vector<8x32xf32>
    %53 = math.tanh %52 : vector<8x32xf32>
    %cst_14 = arith.constant 1.000000e+00 : f32
    %54 = vector.broadcast %cst_14 : f32 to vector<8x32xf32>
    %55 = arith.subf %54, %47 : vector<8x32xf32>
    %56 = arith.mulf %55, %53 : vector<8x32xf32>
    %57 = arith.mulf %47, %29 : vector<8x32xf32>
    %58 = arith.addf %56, %57 : vector<8x32xf32>
    %59 = arith.index_cast %c1_i32 : i32 to index
    %c0_15 = arith.constant 0 : index
    %c0_16 = arith.constant 0 : index
    %60 = vector.load %arg6[%59, %c0_15, %c0_16] : memref<8x8x32xf32, #tpu.memory_space<vmem>>, vector<1x8x32xf32>
    %61 = vector.shape_cast %60 : vector<1x8x32xf32> to vector<8x32xf32>
    %62 = vector.shape_cast %58 : vector<8x32xf32> to vector<1x8x32xf32>
    tpu.vector_store %arg6[%59, %c0_15, %c0_16], %62 {strides = array<i32>} : memref<8x8x32xf32, #tpu.memory_space<vmem>>, vector<1x8x32xf32>,
    %c2_i32 = arith.constant 2 : i32
    %63 = arith.index_cast %c2_i32 : i32 to index
    %c0_17 = arith.constant 0 : index
    %c0_18 = arith.constant 0 : index
    %64 = vector.load %arg1[%63, %c0_17, %c0_18] : memref<8x8x96xf32, #tpu.memory_space<vmem>>, vector<1x8x96xf32>
    %65 = vector.shape_cast %64 : vector<1x8x96xf32> to vector<8x96xf32>
    %cst_19 = arith.constant dense<0.000000e+00> : vector<8x96xf32>
    %66 = tpu.matmul %58, %0, %cst_19 {dimension_numbers = #tpu.dot_dimension_numbers<[1], [0], [0], [1], [0, 0, 1, 1], [], []>} : vector<8x32xf32>, vector<32x96xf32>, vector<8x96xf32> -> vector<8x96xf32>
    %67 = vector.extract_strided_slice %65 {offsets = [0, 0], sizes = [8, 64], strides = [1, 1]} : vector<8x96xf32> to vector<8x64xf32>
    %68 = vector.extract_strided_slice %66 {offsets = [0, 0], sizes = [8, 64], strides = [1, 1]} : vector<8x96xf32> to vector<8x64xf32>
    %69 = arith.addf %67, %68 : vector<8x64xf32>
    %70 = arith.negf %69 : vector<8x64xf32>
    %71 = math.exp %70 : vector<8x64xf32>
    %cst_20 = arith.constant 1.000000e+00 : f32
    %72 = vector.broadcast %cst_20 : f32 to vector<8x64xf32>
    %73 = arith.addf %72, %71 : vector<8x64xf32>
    %74 = arith.divf %72, %73 : vector<8x64xf32>
    %75 = vector.extract_strided_slice %74 {offsets = [0, 0], sizes = [8, 32], strides = [1, 1]} : vector<8x64xf32> to vector<8x32xf32>
    %76 = vector.extract_strided_slice %74 {offsets = [0, 32], sizes = [8, 32], strides = [1, 1]} : vector<8x64xf32> to vector<8x32xf32>
    %77 = vector.extract_strided_slice %65 {offsets = [0, 64], sizes = [8, 32], strides = [1, 1]} : vector<8x96xf32> to vector<8x32xf32>
    %78 = vector.extract_strided_slice %66 {offsets = [0, 64], sizes = [8, 32], strides = [1, 1]} : vector<8x96xf32> to vector<8x32xf32>
    %79 = arith.addf %78, %3 : vector<8x32xf32>
    %80 = arith.mulf %75, %79 : vector<8x32xf32>
    %81 = arith.addf %77, %80 : vector<8x32xf32>
    %82 = math.tanh %81 : vector<8x32xf32>
    %cst_21 = arith.constant 1.000000e+00 : f32
    %83 = vector.broadcast %cst_21 : f32 to vector<8x32xf32>
    %84 = arith.subf %83, %76 : vector<8x32xf32>
    %85 = arith.mulf %84, %82 : vector<8x32xf32>
    %86 = arith.mulf %76, %58 : vector<8x32xf32>
    %87 = arith.addf %85, %86 : vector<8x32xf32>
    %88 = arith.index_cast %c2_i32 : i32 to index
    %c0_22 = arith.constant 0 : index
    %c0_23 = arith.constant 0 : index
    %89 = vector.load %arg6[%88, %c0_22, %c0_23] : memref<8x8x32xf32, #tpu.memory_space<vmem>>, vector<1x8x32xf32>
    %90 = vector.shape_cast %89 : vector<1x8x32xf32> to vector<8x32xf32>
    %91 = vector.shape_cast %87 : vector<8x32xf32> to vector<1x8x32xf32>
    tpu.vector_store %arg6[%88, %c0_22, %c0_23], %91 {strides = array<i32>} : memref<8x8x32xf32, #tpu.memory_space<vmem>>, vector<1x8x32xf32>,
    %c3_i32 = arith.constant 3 : i32
    %92 = arith.index_cast %c3_i32 : i32 to index
    %c0_24 = arith.constant 0 : index
    %c0_25 = arith.constant 0 : index
    %93 = vector.load %arg1[%92, %c0_24, %c0_25] : memref<8x8x96xf32, #tpu.memory_space<vmem>>, vector<1x8x96xf32>
    %94 = vector.shape_cast %93 : vector<1x8x96xf32> to vector<8x96xf32>
    %cst_26 = arith.constant dense<0.000000e+00> : vector<8x96xf32>
    %95 = tpu.matmul %87, %0, %cst_26 {dimension_numbers = #tpu.dot_dimension_numbers<[1], [0], [0], [1], [0, 0, 1, 1], [], []>} : vector<8x32xf32>, vector<32x96xf32>, vector<8x96xf32> -> vector<8x96xf32>
    %96 = vector.extract_strided_slice %94 {offsets = [0, 0], sizes = [8, 64], strides = [1, 1]} : vector<8x96xf32> to vector<8x64xf32>
    %97 = vector.extract_strided_slice %95 {offsets = [0, 0], sizes = [8, 64], strides = [1, 1]} : vector<8x96xf32> to vector<8x64xf32>
    %98 = arith.addf %96, %97 : vector<8x64xf32>
    %99 = arith.negf %98 : vector<8x64xf32>
    %100 = math.exp %99 : vector<8x64xf32>
    %cst_27 = arith.constant 1.000000e+00 : f32
    %101 = vector.broadcast %cst_27 : f32 to vector<8x64xf32>
    %102 = arith.addf %101, %100 : vector<8x64xf32>
    %103 = arith.divf %101, %102 : vector<8x64xf32>
    %104 = vector.extract_strided_slice %103 {offsets = [0, 0], sizes = [8, 32], strides = [1, 1]} : vector<8x64xf32> to vector<8x32xf32>
    %105 = vector.extract_strided_slice %103 {offsets = [0, 32], sizes = [8, 32], strides = [1, 1]} : vector<8x64xf32> to vector<8x32xf32>
    %106 = vector.extract_strided_slice %94 {offsets = [0, 64], sizes = [8, 32], strides = [1, 1]} : vector<8x96xf32> to vector<8x32xf32>
    %107 = vector.extract_strided_slice %95 {offsets = [0, 64], sizes = [8, 32], strides = [1, 1]} : vector<8x96xf32> to vector<8x32xf32>
    %108 = arith.addf %107, %3 : vector<8x32xf32>
    %109 = arith.mulf %104, %108 : vector<8x32xf32>
    %110 = arith.addf %106, %109 : vector<8x32xf32>
    %111 = math.tanh %110 : vector<8x32xf32>
    %cst_28 = arith.constant 1.000000e+00 : f32
    %112 = vector.broadcast %cst_28 : f32 to vector<8x32xf32>
    %113 = arith.subf %112, %105 : vector<8x32xf32>
    %114 = arith.mulf %113, %111 : vector<8x32xf32>
    %115 = arith.mulf %105, %87 : vector<8x32xf32>
    %116 = arith.addf %114, %115 : vector<8x32xf32>
    %117 = arith.index_cast %c3_i32 : i32 to index
    %c0_29 = arith.constant 0 : index
    %c0_30 = arith.constant 0 : index
    %118 = vector.load %arg6[%117, %c0_29, %c0_30] : memref<8x8x32xf32, #tpu.memory_space<vmem>>, vector<1x8x32xf32>
    %119 = vector.shape_cast %118 : vector<1x8x32xf32> to vector<8x32xf32>
    %120 = vector.shape_cast %116 : vector<8x32xf32> to vector<1x8x32xf32>
    tpu.vector_store %arg6[%117, %c0_29, %c0_30], %120 {strides = array<i32>} : memref<8x8x32xf32, #tpu.memory_space<vmem>>, vector<1x8x32xf32>,
    %c4_i32 = arith.constant 4 : i32
    %121 = arith.index_cast %c4_i32 : i32 to index
    %c0_31 = arith.constant 0 : index
    %c0_32 = arith.constant 0 : index
    %122 = vector.load %arg1[%121, %c0_31, %c0_32] : memref<8x8x96xf32, #tpu.memory_space<vmem>>, vector<1x8x96xf32>
    %123 = vector.shape_cast %122 : vector<1x8x96xf32> to vector<8x96xf32>
    %cst_33 = arith.constant dense<0.000000e+00> : vector<8x96xf32>
    %124 = tpu.matmul %116, %0, %cst_33 {dimension_numbers = #tpu.dot_dimension_numbers<[1], [0], [0], [1], [0, 0, 1, 1], [], []>} : vector<8x32xf32>, vector<32x96xf32>, vector<8x96xf32> -> vector<8x96xf32>
    %125 = vector.extract_strided_slice %123 {offsets = [0, 0], sizes = [8, 64], strides = [1, 1]} : vector<8x96xf32> to vector<8x64xf32>
    %126 = vector.extract_strided_slice %124 {offsets = [0, 0], sizes = [8, 64], strides = [1, 1]} : vector<8x96xf32> to vector<8x64xf32>
    %127 = arith.addf %125, %126 : vector<8x64xf32>
    %128 = arith.negf %127 : vector<8x64xf32>
    %129 = math.exp %128 : vector<8x64xf32>
    %cst_34 = arith.constant 1.000000e+00 : f32
    %130 = vector.broadcast %cst_34 : f32 to vector<8x64xf32>
    %131 = arith.addf %130, %129 : vector<8x64xf32>
    %132 = arith.divf %130, %131 : vector<8x64xf32>
    %133 = vector.extract_strided_slice %132 {offsets = [0, 0], sizes = [8, 32], strides = [1, 1]} : vector<8x64xf32> to vector<8x32xf32>
    %134 = vector.extract_strided_slice %132 {offsets = [0, 32], sizes = [8, 32], strides = [1, 1]} : vector<8x64xf32> to vector<8x32xf32>
    %135 = vector.extract_strided_slice %123 {offsets = [0, 64], sizes = [8, 32], strides = [1, 1]} : vector<8x96xf32> to vector<8x32xf32>
    %136 = vector.extract_strided_slice %124 {offsets = [0, 64], sizes = [8, 32], strides = [1, 1]} : vector<8x96xf32> to vector<8x32xf32>
    %137 = arith.addf %136, %3 : vector<8x32xf32>
    %138 = arith.mulf %133, %137 : vector<8x32xf32>
    %139 = arith.addf %135, %138 : vector<8x32xf32>
    %140 = math.tanh %139 : vector<8x32xf32>
    %cst_35 = arith.constant 1.000000e+00 : f32
    %141 = vector.broadcast %cst_35 : f32 to vector<8x32xf32>
    %142 = arith.subf %141, %134 : vector<8x32xf32>
    %143 = arith.mulf %142, %140 : vector<8x32xf32>
    %144 = arith.mulf %134, %116 : vector<8x32xf32>
    %145 = arith.addf %143, %144 : vector<8x32xf32>
    %146 = arith.index_cast %c4_i32 : i32 to index
    %c0_36 = arith.constant 0 : index
    %c0_37 = arith.constant 0 : index
    %147 = vector.load %arg6[%146, %c0_36, %c0_37] : memref<8x8x32xf32, #tpu.memory_space<vmem>>, vector<1x8x32xf32>
    %148 = vector.shape_cast %147 : vector<1x8x32xf32> to vector<8x32xf32>
    %149 = vector.shape_cast %145 : vector<8x32xf32> to vector<1x8x32xf32>
    tpu.vector_store %arg6[%146, %c0_36, %c0_37], %149 {strides = array<i32>} : memref<8x8x32xf32, #tpu.memory_space<vmem>>, vector<1x8x32xf32>,
    %c5_i32 = arith.constant 5 : i32
    %150 = arith.index_cast %c5_i32 : i32 to index
    %c0_38 = arith.constant 0 : index
    %c0_39 = arith.constant 0 : index
    %151 = vector.load %arg1[%150, %c0_38, %c0_39] : memref<8x8x96xf32, #tpu.memory_space<vmem>>, vector<1x8x96xf32>
    %152 = vector.shape_cast %151 : vector<1x8x96xf32> to vector<8x96xf32>
    %cst_40 = arith.constant dense<0.000000e+00> : vector<8x96xf32>
    %153 = tpu.matmul %145, %0, %cst_40 {dimension_numbers = #tpu.dot_dimension_numbers<[1], [0], [0], [1], [0, 0, 1, 1], [], []>} : vector<8x32xf32>, vector<32x96xf32>, vector<8x96xf32> -> vector<8x96xf32>
    %154 = vector.extract_strided_slice %152 {offsets = [0, 0], sizes = [8, 64], strides = [1, 1]} : vector<8x96xf32> to vector<8x64xf32>
    %155 = vector.extract_strided_slice %153 {offsets = [0, 0], sizes = [8, 64], strides = [1, 1]} : vector<8x96xf32> to vector<8x64xf32>
    %156 = arith.addf %154, %155 : vector<8x64xf32>
    %157 = arith.negf %156 : vector<8x64xf32>
    %158 = math.exp %157 : vector<8x64xf32>
    %cst_41 = arith.constant 1.000000e+00 : f32
    %159 = vector.broadcast %cst_41 : f32 to vector<8x64xf32>
    %160 = arith.addf %159, %158 : vector<8x64xf32>
    %161 = arith.divf %159, %160 : vector<8x64xf32>
    %162 = vector.extract_strided_slice %161 {offsets = [0, 0], sizes = [8, 32], strides = [1, 1]} : vector<8x64xf32> to vector<8x32xf32>
    %163 = vector.extract_strided_slice %161 {offsets = [0, 32], sizes = [8, 32], strides = [1, 1]} : vector<8x64xf32> to vector<8x32xf32>
    %164 = vector.extract_strided_slice %152 {offsets = [0, 64], sizes = [8, 32], strides = [1, 1]} : vector<8x96xf32> to vector<8x32xf32>
    %165 = vector.extract_strided_slice %153 {offsets = [0, 64], sizes = [8, 32], strides = [1, 1]} : vector<8x96xf32> to vector<8x32xf32>
    %166 = arith.addf %165, %3 : vector<8x32xf32>
    %167 = arith.mulf %162, %166 : vector<8x32xf32>
    %168 = arith.addf %164, %167 : vector<8x32xf32>
    %169 = math.tanh %168 : vector<8x32xf32>
    %cst_42 = arith.constant 1.000000e+00 : f32
    %170 = vector.broadcast %cst_42 : f32 to vector<8x32xf32>
    %171 = arith.subf %170, %163 : vector<8x32xf32>
    %172 = arith.mulf %171, %169 : vector<8x32xf32>
    %173 = arith.mulf %163, %145 : vector<8x32xf32>
    %174 = arith.addf %172, %173 : vector<8x32xf32>
    %175 = arith.index_cast %c5_i32 : i32 to index
    %c0_43 = arith.constant 0 : index
    %c0_44 = arith.constant 0 : index
    %176 = vector.load %arg6[%175, %c0_43, %c0_44] : memref<8x8x32xf32, #tpu.memory_space<vmem>>, vector<1x8x32xf32>
    %177 = vector.shape_cast %176 : vector<1x8x32xf32> to vector<8x32xf32>
    %178 = vector.shape_cast %174 : vector<8x32xf32> to vector<1x8x32xf32>
    tpu.vector_store %arg6[%175, %c0_43, %c0_44], %178 {strides = array<i32>} : memref<8x8x32xf32, #tpu.memory_space<vmem>>, vector<1x8x32xf32>,
    %c6_i32 = arith.constant 6 : i32
    %179 = arith.index_cast %c6_i32 : i32 to index
    %c0_45 = arith.constant 0 : index
    %c0_46 = arith.constant 0 : index
    %180 = vector.load %arg1[%179, %c0_45, %c0_46] : memref<8x8x96xf32, #tpu.memory_space<vmem>>, vector<1x8x96xf32>
    %181 = vector.shape_cast %180 : vector<1x8x96xf32> to vector<8x96xf32>
    %cst_47 = arith.constant dense<0.000000e+00> : vector<8x96xf32>
    %182 = tpu.matmul %174, %0, %cst_47 {dimension_numbers = #tpu.dot_dimension_numbers<[1], [0], [0], [1], [0, 0, 1, 1], [], []>} : vector<8x32xf32>, vector<32x96xf32>, vector<8x96xf32> -> vector<8x96xf32>
    %183 = vector.extract_strided_slice %181 {offsets = [0, 0], sizes = [8, 64], strides = [1, 1]} : vector<8x96xf32> to vector<8x64xf32>
    %184 = vector.extract_strided_slice %182 {offsets = [0, 0], sizes = [8, 64], strides = [1, 1]} : vector<8x96xf32> to vector<8x64xf32>
    %185 = arith.addf %183, %184 : vector<8x64xf32>
    %186 = arith.negf %185 : vector<8x64xf32>
    %187 = math.exp %186 : vector<8x64xf32>
    %cst_48 = arith.constant 1.000000e+00 : f32
    %188 = vector.broadcast %cst_48 : f32 to vector<8x64xf32>
    %189 = arith.addf %188, %187 : vector<8x64xf32>
    %190 = arith.divf %188, %189 : vector<8x64xf32>
    %191 = vector.extract_strided_slice %190 {offsets = [0, 0], sizes = [8, 32], strides = [1, 1]} : vector<8x64xf32> to vector<8x32xf32>
    %192 = vector.extract_strided_slice %190 {offsets = [0, 32], sizes = [8, 32], strides = [1, 1]} : vector<8x64xf32> to vector<8x32xf32>
    %193 = vector.extract_strided_slice %181 {offsets = [0, 64], sizes = [8, 32], strides = [1, 1]} : vector<8x96xf32> to vector<8x32xf32>
    %194 = vector.extract_strided_slice %182 {offsets = [0, 64], sizes = [8, 32], strides = [1, 1]} : vector<8x96xf32> to vector<8x32xf32>
    %195 = arith.addf %194, %3 : vector<8x32xf32>
    %196 = arith.mulf %191, %195 : vector<8x32xf32>
    %197 = arith.addf %193, %196 : vector<8x32xf32>
    %198 = math.tanh %197 : vector<8x32xf32>
    %cst_49 = arith.constant 1.000000e+00 : f32
    %199 = vector.broadcast %cst_49 : f32 to vector<8x32xf32>
    %200 = arith.subf %199, %192 : vector<8x32xf32>
    %201 = arith.mulf %200, %198 : vector<8x32xf32>
    %202 = arith.mulf %192, %174 : vector<8x32xf32>
    %203 = arith.addf %201, %202 : vector<8x32xf32>
    %204 = arith.index_cast %c6_i32 : i32 to index
    %c0_50 = arith.constant 0 : index
    %c0_51 = arith.constant 0 : index
    %205 = vector.load %arg6[%204, %c0_50, %c0_51] : memref<8x8x32xf32, #tpu.memory_space<vmem>>, vector<1x8x32xf32>
    %206 = vector.shape_cast %205 : vector<1x8x32xf32> to vector<8x32xf32>
    %207 = vector.shape_cast %203 : vector<8x32xf32> to vector<1x8x32xf32>
    tpu.vector_store %arg6[%204, %c0_50, %c0_51], %207 {strides = array<i32>} : memref<8x8x32xf32, #tpu.memory_space<vmem>>, vector<1x8x32xf32>,
    %c7_i32 = arith.constant 7 : i32
    %208 = arith.index_cast %c7_i32 : i32 to index
    %c0_52 = arith.constant 0 : index
    %c0_53 = arith.constant 0 : index
    %209 = vector.load %arg1[%208, %c0_52, %c0_53] : memref<8x8x96xf32, #tpu.memory_space<vmem>>, vector<1x8x96xf32>
    %210 = vector.shape_cast %209 : vector<1x8x96xf32> to vector<8x96xf32>
    %cst_54 = arith.constant dense<0.000000e+00> : vector<8x96xf32>
    %211 = tpu.matmul %203, %0, %cst_54 {dimension_numbers = #tpu.dot_dimension_numbers<[1], [0], [0], [1], [0, 0, 1, 1], [], []>} : vector<8x32xf32>, vector<32x96xf32>, vector<8x96xf32> -> vector<8x96xf32>
    %212 = vector.extract_strided_slice %210 {offsets = [0, 0], sizes = [8, 64], strides = [1, 1]} : vector<8x96xf32> to vector<8x64xf32>
    %213 = vector.extract_strided_slice %211 {offsets = [0, 0], sizes = [8, 64], strides = [1, 1]} : vector<8x96xf32> to vector<8x64xf32>
    %214 = arith.addf %212, %213 : vector<8x64xf32>
    %215 = arith.negf %214 : vector<8x64xf32>
    %216 = math.exp %215 : vector<8x64xf32>
    %cst_55 = arith.constant 1.000000e+00 : f32
    %217 = vector.broadcast %cst_55 : f32 to vector<8x64xf32>
    %218 = arith.addf %217, %216 : vector<8x64xf32>
    %219 = arith.divf %217, %218 : vector<8x64xf32>
    %220 = vector.extract_strided_slice %219 {offsets = [0, 0], sizes = [8, 32], strides = [1, 1]} : vector<8x64xf32> to vector<8x32xf32>
    %221 = vector.extract_strided_slice %219 {offsets = [0, 32], sizes = [8, 32], strides = [1, 1]} : vector<8x64xf32> to vector<8x32xf32>
    %222 = vector.extract_strided_slice %210 {offsets = [0, 64], sizes = [8, 32], strides = [1, 1]} : vector<8x96xf32> to vector<8x32xf32>
    %223 = vector.extract_strided_slice %211 {offsets = [0, 64], sizes = [8, 32], strides = [1, 1]} : vector<8x96xf32> to vector<8x32xf32>
    %224 = arith.addf %223, %3 : vector<8x32xf32>
    %225 = arith.mulf %220, %224 : vector<8x32xf32>
    %226 = arith.addf %222, %225 : vector<8x32xf32>
    %227 = math.tanh %226 : vector<8x32xf32>
    %cst_56 = arith.constant 1.000000e+00 : f32
    %228 = vector.broadcast %cst_56 : f32 to vector<8x32xf32>
    %229 = arith.subf %228, %221 : vector<8x32xf32>
    %230 = arith.mulf %229, %227 : vector<8x32xf32>
    %231 = arith.mulf %221, %203 : vector<8x32xf32>
    %232 = arith.addf %230, %231 : vector<8x32xf32>
    %233 = arith.index_cast %c7_i32 : i32 to index
    %c0_57 = arith.constant 0 : index
    %c0_58 = arith.constant 0 : index
    %234 = vector.load %arg6[%233, %c0_57, %c0_58] : memref<8x8x32xf32, #tpu.memory_space<vmem>>, vector<1x8x32xf32>
    %235 = vector.shape_cast %234 : vector<1x8x32xf32> to vector<8x32xf32>
    %236 = vector.shape_cast %232 : vector<8x32xf32> to vector<1x8x32xf32>
    tpu.vector_store %arg6[%233, %c0_57, %c0_58], %236 {strides = array<i32>} : memref<8x8x32xf32, #tpu.memory_space<vmem>>, vector<1x8x32xf32>,
    %c8_i32 = arith.constant 8 : i32
    %c0_59 = arith.constant 0 : index
    %c0_60 = arith.constant 0 : index
    %c0_61 = arith.constant 0 : index
    %237 = vector.load %arg6[%c0_59, %c0_60, %c0_61] : memref<8x8x32xf32, #tpu.memory_space<vmem>>, vector<8x8x32xf32>
    %c0_62 = arith.constant 0 : index
    %c0_63 = arith.constant 0 : index
    %238 = vector.load %arg4[%c0_62, %c0_63] : memref<1x32xf32, #tpu.memory_space<vmem>>, vector<1x32xf32>
    %239 = vector.shape_cast %238 : vector<1x32xf32> to vector<1x1x32xf32>
    %240 = vector.broadcast %239 : vector<1x1x32xf32> to vector<8x8x32xf32>
    %241 = arith.mulf %237, %240 : vector<8x8x32xf32>
    %cst_64 = arith.constant dense<0.000000e+00> : vector<8x8xf32>
    %242 = vector.multi_reduction <add>, %241, %cst_64 [2] : vector<8x8x32xf32> to vector<8x8xf32>
    %243 = vector.shape_cast %242 : vector<8x8xf32> to vector<8x8x1xf32>
    %c0_65 = arith.constant 0 : index
    %c0_66 = arith.constant 0 : index
    %c0_67 = arith.constant 0 : index
    %244 = vector.load %arg5[%c0_65, %c0_66, %c0_67] : memref<8x8x1xf32, #tpu.memory_space<vmem>>, vector<8x8x1xf32>
    tpu.vector_store %arg5[%c0_65, %c0_66, %c0_67], %243 {strides = array<i32>} : memref<8x8x1xf32, #tpu.memory_space<vmem>>, vector<8x8x1xf32>,
    return
  }
  func.func @transform_0(%arg0: i32) -> (i32, i32, i32) {
    %c0_i32 = arith.constant 0 : i32
    %c0_i32_0 = arith.constant 0 : i32
    %c0_i32_1 = arith.constant 0 : i32
    return %c0_i32, %arg0, %c0_i32_0 : i32, i32, i32
  }
  func.func @transform_1(%arg0: i32) -> (i32, i32) {
    %c0_i32 = arith.constant 0 : i32
    %c0_i32_0 = arith.constant 0 : i32
    %c0_i32_1 = arith.constant 0 : i32
    return %c0_i32, %c0_i32_0 : i32, i32
  }
  func.func @transform_2(%arg0: i32) -> (i32, i32) {
    %c0_i32 = arith.constant 0 : i32
    %c0_i32_0 = arith.constant 0 : i32
    %c0_i32_1 = arith.constant 0 : i32
    return %c0_i32, %c0_i32_0 : i32, i32
  }
  func.func @transform_3(%arg0: i32) -> (i32, i32) {
    %c0_i32 = arith.constant 0 : i32
    %c0_i32_0 = arith.constant 0 : i32
    %c0_i32_1 = arith.constant 0 : i32
    return %c0_i32, %c0_i32_0 : i32, i32
  }
  func.func @transform_4(%arg0: i32) -> (i32, i32, i32) {
    %c0_i32 = arith.constant 0 : i32
    %c0_i32_0 = arith.constant 0 : i32
    %c0_i32_1 = arith.constant 0 : i32
    return %c0_i32, %arg0, %c0_i32_0 : i32, i32, i32
  }
}

</mosaic_0001>

<bundles_post_ra>
// kernel: smodel_forward.1
= control target key start
LH: loop header
LB: loop body
LE: loop exit
PB: predicated region body
PF: predicated region fallthrough
CT: control target
= control target key end

     0   :  { %v1199_v0 = vmov 0.0|0.0   ;;  %vm1200_vm0 = vmmov 0   ;;  %v1201_v4 = vmov 0.0   ;;  %s1202_s25 = smov 64   ;;  %s1203_s26 = smov 96   ;;  %vm28_vm1 = vcmask 261120   ;;  %s1422_s1 = inlined_call_operand.vmem [shape: f32[32,96], index: 1, kind: input, shape index: {}]   ;;  %s1423_s2 = inlined_call_operand.vmem [shape: f32[1,32], index: 2, kind: input, shape index: {}]   ;;  %s1424_s0 = inlined_call_operand.vmem [shape: f32[8,8,96], index: 0, kind: input, shape index: {}]   ;;  %s1425_s3 = inlined_call_operand.vmem [shape: f32[1,32], index: 3, kind: input, shape index: {}]   ;;  %s1426_s4 = inlined_call_operand.vmem [shape: f32[8,8,1], index: 4, kind: output, shape index: {}]  }
   0x1   :  { %1098 = vmatprep.subr.bf16.mxu0 %v1199_v0  ;;  %v17_v1 = vld [vmem:[%s1422_s1] sm:$0xff]  ;;  %v18_v2 = vld [vmem:[%s1422_s1 + $0x8] sm:$0xff]  ;;  %v19_v3 = vld [vmem:[%s1422_s1 + $0x10] sm:$0xff]  ;;  %1018 = vmatprep.mubr.msk.f32.mxu0 %vm1200_vm0, %v1201_v4  ;;  %vm933_vm2 = vcmask 7168  }
   0x2   :  { %v1241_v5 = vpack.c.bf16 %v18_v2, %v17_v1  ;;  %v20_v6 = vld [vmem:[%s1422_s1 + $0x18] sm:$0xff]  ;;  %v946_v7 = vld [vmem:[%s1423_s2] ss:$0 sm:$0xff]  ;;  %1104 = vmatprep.subr.bf16.mxu1 %v1199_v0  ;;  %1029 = vmatprep.mubr.msk.f32.mxu1 %vm1200_vm0, %v1201_v4  ;;  %v948_v33 = vld [vmem:[%s1424_s0 + $0x8] sm:$0xff] }
   0x3   :  { %109 = vrot.lane.b32.xlu0 %v946_v7, %s1202_s25  ;;  %v1254_v8 = vpack.c.bf16 %v20_v6, %v19_v3  ;;  %v27_v13 = vld [vmem:[%s1424_s0] sm:$0xff]  ;;  %v951_v53 = vld [vmem:[%s1424_s0 + $0x10] sm:$0xff] }
   0x4   :  { %1100 = vmatpush3.bf16.msra.mxu0 %v1241_v5  ;;  %1106 = vmatpush3.bf16.msra.mxu1 %v1241_v5 }
   0x5   :  { %1101 = vmatprep.subr.bf16.mxu0 %v1199_v0  ;;  %1107 = vmatprep.subr.bf16.mxu1 %v1199_v0 }
   0x8   :  { %1103 = vmatpush3.bf16.msra.mxu0 %v1254_v8  ;;  %1109 = vmatpush3.bf16.msra.mxu1 %v1254_v8 }
   0x9   :  { %1110 = vmatprep.subr.bf16.mxu0 %v1199_v0  ;;  %1116 = vmatprep.subr.bf16.mxu1 %v1199_v0 }
   0xb   :  { %1019 = vmatmul.mubr.f32.vlgmr.msra.gmra.mrb[0].mxu0 %v1201_v4 }
   0xc   :  { %1112 = vmatpush3.bf16.msra.mxu0 %v1241_v5  ;;  %1040 = vmatprep.mubr.msk.f32.mxu0 %vm1200_vm0, %v1201_v4 }
   0xd   :  { %1113 = vmatprep.subr.bf16.mxu0 %v1199_v0 }
  0x10   :  { %1115 = vmatpush3.bf16.msra.mxu0 %v1254_v8 }
  0x11   :  { %1122 = vmatprep.subr.bf16.mxu0 %v1199_v0 }
  0x75   :  { %v1270_v9 = vpop.permute.xlu0 %109 }
  0xde   :  { %v98_v10 = vpop.f32.mrb[0].mxu0 }
  0xdf   :  { %v112_v11 = vadd.f32 %v1270_v9, %v98_v10  ;;  %v1020_v12 = vpop.f32.mrb[1].mxu0  ;;  %v102_v14 = vadd.f32 %v98_v10, %v27_v13 }
  0xe1   :  { %114 = vrot.lane.b32.xlu0 %v112_v11, %s1202_s25  ;;  %v947_v15 = vmul.f32 -1.442695, %v102_v14  ;;  %v954_v14 = vld [vmem:[%s1424_s0 + $0x18] sm:$0xff] }
  0xe3   :  { %1151 = vpow2.f32 %v947_v15 }
  0xed   :  { %v1152_v16 = vpop.eup %1151 }
  0xee   :  { %v106_v17 = vadd.f32 1.0, %v1152_v16 }
  0xf0   :  { %1153 = vrcp.f32 %v106_v17 }
  0xfa   :  { %v1154_v18 = vpop.eup %1153 }
  0xfb   :  { %v124_v24 = vsub.f32 1.0, %v1154_v18  ;;  %v130_v26 = vmul.f32 0.0, %v1154_v18 }
 0x153   :  { %v115_v19 = vpop.permute.xlu0 %114 }
 0x154   :  { %v117_v20 = vmul.f32 %v1154_v18, %v115_v19 }
 0x156   :  { %119 = vrot.lane.b32.xlu1 %v117_v20, %s1202_s25 }
 0x1c8   :  { %v120_v21 = vpop.permute.xlu1 %119 }
 0x1c9   :  { %v122_v22 = vadd.f32 %v120_v21, %v27_v13 }
 0x1cb   :  { %1155 = vtanh.f32 %v122_v22 }
 0x1d5   :  { %v1156_v23 = vpop.eup %1155 }
 0x1d6   :  { %126 = vrot.lane.b32.xlu1 %v1156_v23, %s1203_s26 }
 0x248   :  { %v127_v25 = vpop.permute.xlu1 %126 }
 0x249   :  { %v129_v27 = vmul.f32 %v127_v25, %v124_v24 }
 0x24b   :  { %v131_v28 = vadd.f32 %v130_v26, %v129_v27 }
 0x24d   :  { %133 = vrot.lane.b32.xlu0 %v131_v28, %s1203_s26 }
 0x2bf   :  { %v134_v29 = vpop.permute.xlu0 %133 }
 0x2c0   :  { %136 = vst.msk [vmem:[#allocation2] sm:$0xff] %vm28_vm1, %v134_v29  ;;  %1030 = vmatmul.mubr.msk.f32.vlgmr.msra.gmra.mrb[0].mxu1 %vm28_vm1, %v134_v29 }
 0x2c1   :  { %1118 = vmatpush3.bf16.msra.mxu1 %v1241_v5  ;;  %1051 = vmatprep.mubr.msk.f32.mxu1 %vm1200_vm0, %v1201_v4 }
 0x2c2   :  { %1119 = vmatprep.subr.bf16.mxu1 %v1199_v0 }
 0x2c5   :  { %1121 = vmatpush3.bf16.msra.mxu1 %v1254_v8 }
 0x2c6   :  { %1128 = vmatprep.subr.bf16.mxu1 %v1199_v0 }
 0x393   :  { %v207_v30 = vpop.f32.mrb[0].mxu1 }
 0x394   :  { %v218_v31 = vadd.f32 %v207_v30, %v1270_v9  ;;  %v1031_v32 = vpop.f32.mrb[1].mxu1  ;;  %v211_v34 = vadd.f32 %v948_v33, %v207_v30 }
 0x396   :  { %220 = vrot.lane.b32.xlu1 %v218_v31, %s1202_s25  ;;  %v950_v35 = vmul.f32 -1.442695, %v211_v34  ;;  %v957_v34 = vld [vmem:[%s1424_s0 + $0x20] sm:$0xff] }
 0x398   :  { %1157 = vpow2.f32 %v950_v35 }
 0x3a2   :  { %v1158_v36 = vpop.eup %1157 }
 0x3a3   :  { %v215_v37 = vadd.f32 1.0, %v1158_v36 }
 0x3a5   :  { %1159 = vrcp.f32 %v215_v37 }
 0x3af   :  { %v1160_v38 = vpop.eup %1159 }
 0x3b0   :  { %v230_v44 = vsub.f32 1.0, %v1160_v38  ;;  %v236_v46 = vmul.f32 %v1160_v38, %v131_v28 }
 0x408   :  { %v221_v39 = vpop.permute.xlu1 %220 }
 0x409   :  { %v223_v40 = vmul.f32 %v1160_v38, %v221_v39 }
 0x40b   :  { %225 = vrot.lane.b32.xlu0 %v223_v40, %s1202_s25 }
 0x47d   :  { %v226_v41 = vpop.permute.xlu0 %225 }
 0x47e   :  { %v228_v42 = vadd.f32 %v948_v33, %v226_v41 }
 0x480   :  { %1161 = vtanh.f32 %v228_v42 }
 0x48a   :  { %v1162_v43 = vpop.eup %1161 }
 0x48b   :  { %232 = vrot.lane.b32.xlu1 %v1162_v43, %s1203_s26 }
 0x4fd   :  { %v233_v45 = vpop.permute.xlu1 %232 }
 0x4fe   :  { %v235_v47 = vmul.f32 %v233_v45, %v230_v44 }
 0x500   :  { %v237_v48 = vadd.f32 %v236_v46, %v235_v47 }
 0x502   :  { %239 = vrot.lane.b32.xlu0 %v237_v48, %s1203_s26 }
 0x574   :  { %v240_v49 = vpop.permute.xlu0 %239 }
 0x575   :  { %243 = vst.msk [vmem:[#allocation2 + $0x8] sm:$0xff] %vm28_vm1, %v240_v49  ;;  %1041 = vmatmul.mubr.msk.f32.vlgmr.msra.gmra.mrb[2].mxu0 %vm28_vm1, %v240_v49 }
 0x576   :  { %1124 = vmatpush3.bf16.msra.mxu0 %v1241_v5  ;;  %1062 = vmatprep.mubr.msk.f32.mxu0 %vm1200_vm0, %v1201_v4 }
 0x577   :  { %1125 = vmatprep.subr.bf16.mxu0 %v1199_v0 }
 0x57a   :  { %1127 = vmatpush3.bf16.msra.mxu0 %v1254_v8 }
 0x57b   :  { %1134 = vmatprep.subr.bf16.mxu0 %v1199_v0 }
 0x648   :  { %v314_v50 = vpop.f32.mrb[2].mxu0 }
 0x649   :  { %v325_v51 = vadd.f32 %v314_v50, %v1270_v9  ;;  %v1042_v52 = vpop.f32.mrb[3].mxu0  ;;  %v318_v54 = vadd.f32 %v951_v53, %v314_v50 }
 0x64b   :  { %327 = vrot.lane.b32.xlu1 %v325_v51, %s1202_s25  ;;  %v953_v55 = vmul.f32 -1.442695, %v318_v54  ;;  %v960_v54 = vld [vmem:[%s1424_s0 + $0x28] sm:$0xff] }
 0x64d   :  { %1163 = vpow2.f32 %v953_v55 }
 0x657   :  { %v1164_v56 = vpop.eup %1163 }
 0x658   :  { %v322_v57 = vadd.f32 1.0, %v1164_v56 }
 0x65a   :  { %1165 = vrcp.f32 %v322_v57 }
 0x664   :  { %v1166_v58 = vpop.eup %1165 }
 0x665   :  { %v337_v1 = vsub.f32 1.0, %v1166_v58  ;;  %v343_v3 = vmul.f32 %v1166_v58, %v237_v48 }
 0x6bd   :  { %v328_v59 = vpop.permute.xlu1 %327 }
 0x6be   :  { %v330_v60 = vmul.f32 %v1166_v58, %v328_v59 }
 0x6c0   :  { %332 = vrot.lane.b32.xlu0 %v330_v60, %s1202_s25 }
 0x732   :  { %v333_v61 = vpop.permute.xlu0 %332 }
 0x733   :  { %v335_v62 = vadd.f32 %v951_v53, %v333_v61 }
 0x735   :  { %1167 = vtanh.f32 %v335_v62 }
 0x73f   :  { %v1168_v63 = vpop.eup %1167 }
 0x740   :  { %339 = vrot.lane.b32.xlu1 %v1168_v63, %s1203_s26 }
 0x7b2   :  { %v340_v2 = vpop.permute.xlu1 %339 }
 0x7b3   :  { %v342_v6 = vmul.f32 %v340_v2, %v337_v1 }
 0x7b5   :  { %v344_v7 = vadd.f32 %v343_v3, %v342_v6 }
 0x7b7   :  { %346 = vrot.lane.b32.xlu0 %v344_v7, %s1203_s26 }
 0x829   :  { %v347_v10 = vpop.permute.xlu0 %346 }
 0x82a   :  { %350 = vst.msk [vmem:[#allocation2 + $0x10] sm:$0xff] %vm28_vm1, %v347_v10  ;;  %1052 = vmatmul.mubr.msk.f32.vlgmr.msra.gmra.mrb[2].mxu1 %vm28_vm1, %v347_v10 }
 0x82b   :  { %1130 = vmatpush3.bf16.msra.mxu1 %v1241_v5  ;;  %1073 = vmatprep.mubr.msk.f32.mxu1 %vm1200_vm0, %v1201_v4 }
 0x82c   :  { %1131 = vmatprep.subr.bf16.mxu1 %v1199_v0 }
 0x82f   :  { %1133 = vmatpush3.bf16.msra.mxu1 %v1254_v8 }
 0x830   :  { %1140 = vmatprep.subr.bf16.mxu1 %v1199_v0 }
 0x8fd   :  { %v421_v11 = vpop.f32.mrb[2].mxu1 }
 0x8fe   :  { %v432_v12 = vadd.f32 %v421_v11, %v1270_v9  ;;  %v1053_v13 = vpop.f32.mrb[3].mxu1  ;;  %v425_v15 = vadd.f32 %v954_v14, %v421_v11  ;;  %v963_v11 = vld [vmem:[%s1424_s0 + $0x30] sm:$0xff] }
 0x900   :  { %434 = vrot.lane.b32.xlu1 %v432_v12, %s1202_s25  ;;  %v956_v16 = vmul.f32 -1.442695, %v425_v15 }
 0x902   :  { %1169 = vpow2.f32 %v956_v16 }
 0x90c   :  { %v1170_v17 = vpop.eup %1169 }
 0x90d   :  { %v429_v18 = vadd.f32 1.0, %v1170_v17 }
 0x90f   :  { %1171 = vrcp.f32 %v429_v18 }
 0x919   :  { %v1172_v19 = vpop.eup %1171 }
 0x91a   :  { %v444_v25 = vsub.f32 1.0, %v1172_v19  ;;  %v450_v27 = vmul.f32 %v1172_v19, %v344_v7 }
 0x972   :  { %v435_v20 = vpop.permute.xlu1 %434 }
 0x973   :  { %v437_v21 = vmul.f32 %v1172_v19, %v435_v20 }
 0x975   :  { %439 = vrot.lane.b32.xlu0 %v437_v21, %s1202_s25 }
 0x9e7   :  { %v440_v22 = vpop.permute.xlu0 %439 }
 0x9e8   :  { %v442_v23 = vadd.f32 %v954_v14, %v440_v22 }
 0x9ea   :  { %1173 = vtanh.f32 %v442_v23 }
 0x9f4   :  { %v1174_v24 = vpop.eup %1173 }
 0x9f5   :  { %446 = vrot.lane.b32.xlu1 %v1174_v24, %s1203_s26 }
 0xa67   :  { %v447_v26 = vpop.permute.xlu1 %446 }
 0xa68   :  { %v449_v28 = vmul.f32 %v447_v26, %v444_v25 }
 0xa6a   :  { %v451_v29 = vadd.f32 %v450_v27, %v449_v28 }
 0xa6c   :  { %453 = vrot.lane.b32.xlu0 %v451_v29, %s1203_s26 }
 0xade   :  { %v454_v30 = vpop.permute.xlu0 %453 }
 0xadf   :  { %457 = vst.msk [vmem:[#allocation2 + $0x18] sm:$0xff] %vm28_vm1, %v454_v30  ;;  %1063 = vmatmul.mubr.msk.f32.vlgmr.msra.gmra.mrb[4].mxu0 %vm28_vm1, %v454_v30 }
 0xae0   :  { %1136 = vmatpush3.bf16.msra.mxu0 %v1241_v5  ;;  %1084 = vmatprep.mubr.msk.f32.mxu0 %vm1200_vm0, %v1201_v4 }
 0xae1   :  { %1137 = vmatprep.subr.bf16.mxu0 %v1199_v0 }
 0xae4   :  { %1139 = vmatpush3.bf16.msra.mxu0 %v1254_v8 }
 0xbb2   :  { %v528_v31 = vpop.f32.mrb[4].mxu0 }
 0xbb3   :  { %v539_v32 = vadd.f32 %v528_v31, %v1270_v9  ;;  %v1064_v33 = vpop.f32.mrb[5].mxu0  ;;  %v532_v35 = vadd.f32 %v957_v34, %v528_v31  ;;  %v966_v31 = vld [vmem:[%s1424_s0 + $0x38] sm:$0xff] }
 0xbb5   :  { %541 = vrot.lane.b32.xlu1 %v539_v32, %s1202_s25  ;;  %v959_v36 = vmul.f32 -1.442695, %v532_v35 }
 0xbb7   :  { %1175 = vpow2.f32 %v959_v36 }
 0xbc1   :  { %v1176_v37 = vpop.eup %1175 }
 0xbc2   :  { %v536_v38 = vadd.f32 1.0, %v1176_v37 }
 0xbc4   :  { %1177 = vrcp.f32 %v536_v38 }
 0xbce   :  { %v1178_v39 = vpop.eup %1177 }
 0xbcf   :  { %v551_v45 = vsub.f32 1.0, %v1178_v39  ;;  %v557_v47 = vmul.f32 %v1178_v39, %v451_v29 }
 0xc27   :  { %v542_v40 = vpop.permute.xlu1 %541 }
 0xc28   :  { %v544_v41 = vmul.f32 %v1178_v39, %v542_v40 }
 0xc2a   :  { %546 = vrot.lane.b32.xlu0 %v544_v41, %s1202_s25  ;;  %v886_v41 = vld [vmem:[#allocation2] sm:$0xff] }
 0xc9c   :  { %v547_v42 = vpop.permute.xlu0 %546 }
 0xc9d   :  { %v549_v43 = vadd.f32 %v957_v34, %v547_v42  ;;  %v969_v42 = vld [vmem:[%s1425_s3] ss:$0 sm:$0xff] }
 0xc9f   :  { %1179 = vtanh.f32 %v549_v43  ;;  %v901_v43 = vmul.f32 %v969_v42, %v886_v41 }
 0xca9   :  { %v1180_v44 = vpop.eup %1179 }
 0xcaa   :  { %553 = vrot.lane.b32.xlu1 %v1180_v44, %s1203_s26  ;;  %v889_v44 = vld [vmem:[#allocation2 + $0x18] sm:$0xff] }
 0xd1c   :  { %v554_v46 = vpop.permute.xlu1 %553 }
 0xd1d   :  { %v556_v48 = vmul.f32 %v554_v46, %v551_v45  ;;  %v909_v45 = vsel %vm28_vm1, %v901_v43, 0.0  ;;  %v904_v46 = vmul.f32 %v969_v42, %v889_v44 }
 0xd1f   :  { %v558_v49 = vadd.f32 %v557_v47, %v556_v48  ;;  %v918_v48 = vsel %vm28_vm1, %v904_v46, 0.0 }
 0xd21   :  { %560 = vrot.lane.b32.xlu0 %v558_v49, %s1203_s26 }
 0xd93   :  { %v561_v50 = vpop.permute.xlu0 %560 }
 0xd94   :  { %564 = vst.msk [vmem:[#allocation2 + $0x20] sm:$0xff] %vm28_vm1, %v561_v50  ;;  %1074 = vmatmul.mubr.msk.f32.vlgmr.msra.gmra.mrb[4].mxu1 %vm28_vm1, %v561_v50 }
 0xd95   :  { %1142 = vmatpush3.bf16.msra.mxu1 %v1241_v5  ;;  %1095 = vmatprep.mubr.msk.f32.mxu1 %vm1200_vm0, %v1201_v4 }
 0xd96   :  { %1143 = vmatprep.subr.bf16.mxu1 %v1199_v0 }
 0xd99   :  { %1145 = vmatpush3.bf16.msra.mxu1 %v1254_v8 }
 0xe67   :  { %v635_v51 = vpop.f32.mrb[4].mxu1 }
 0xe68   :  { %v646_v52 = vadd.f32 %v635_v51, %v1270_v9  ;;  %v1075_v53 = vpop.f32.mrb[5].mxu1  ;;  %v639_v55 = vadd.f32 %v960_v54, %v635_v51 }
 0xe6a   :  { %648 = vrot.lane.b32.xlu1 %v646_v52, %s1202_s25  ;;  %v962_v56 = vmul.f32 -1.442695, %v639_v55 }
 0xe6c   :  { %1181 = vpow2.f32 %v962_v56  ;;  %v887_v56 = vld [vmem:[#allocation2 + $0x8] sm:$0xff] }
 0xe76   :  { %v1182_v5 = vpop.eup %1181 }
 0xe77   :  { %v643_v57 = vadd.f32 1.0, %v1182_v5  ;;  %v902_v5 = vmul.f32 %v969_v42, %v887_v56 }
 0xe79   :  { %1183 = vrcp.f32 %v643_v57  ;;  %v888_v57 = vld [vmem:[#allocation2 + $0x10] sm:$0xff] }
 0xe83   :  { %v1184_v4 = vpop.eup %1183 }
 0xe84   :  { %v658_v61 = vsub.f32 1.0, %v1184_v4  ;;  %v664_v63 = vmul.f32 %v1184_v4, %v558_v49 }
 0xedc   :  { %v649_v0 = vpop.permute.xlu1 %648 }
 0xedd   :  { %v651_v58 = vmul.f32 %v1184_v4, %v649_v0  ;;  %v912_v4 = vsel %vm28_vm1, %v902_v5, 0.0  ;;  %v903_v0 = vmul.f32 %v969_v42, %v888_v57 }
 0xedf   :  { %653 = vrot.lane.b32.xlu0 %v651_v58, %s1202_s25  ;;  %v890_v58 = vld [vmem:[#allocation2 + $0x20] sm:$0xff] }
 0xf51   :  { %v654_v8 = vpop.permute.xlu0 %653 }
 0xf52   :  { %v656_v59 = vadd.f32 %v960_v54, %v654_v8  ;;  %v915_v8 = vsel %vm28_vm1, %v903_v0, 0.0 }
 0xf54   :  { %1185 = vtanh.f32 %v656_v59  ;;  %v905_v59 = vmul.f32 %v969_v42, %v890_v58 }
 0xf5e   :  { %v1186_v60 = vpop.eup %1185 }
 0xf5f   :  { %660 = vrot.lane.b32.xlu1 %v1186_v60, %s1203_s26 }
 0xfd1   :  { %v661_v62 = vpop.permute.xlu1 %660 }
 0xfd2   :  { %v663_v1 = vmul.f32 %v661_v62, %v658_v61  ;;  %v921_v61 = vsel %vm28_vm1, %v905_v59, 0.0 }
 0xfd4   :  { %v665_v2 = vadd.f32 %v664_v63, %v663_v1 }
 0xfd6   :  { %667 = vrot.lane.b32.xlu0 %v665_v2, %s1203_s26 }
0x1048   :  { %v668_v3 = vpop.permute.xlu0 %667 }
0x1049   :  { %671 = vst.msk [vmem:[#allocation2 + $0x28] sm:$0xff] %vm28_vm1, %v668_v3  ;;  %1085 = vmatmul.mubr.msk.f32.vlgmr.msra.gmra.mrb[6].mxu0 %vm28_vm1, %v668_v3 }
0x1050   :  { %v891_v47 = vld [vmem:[#allocation2 + $0x28] sm:$0xff] }
0x1051   :  { %v906_v49 = vmul.f32 %v969_v42, %v891_v47 }
0x1053   :  { %v924_v50 = vsel %vm28_vm1, %v906_v49, 0.0 }
0x111c   :  { %v742_v6 = vpop.f32.mrb[6].mxu0 }
0x111d   :  { %v753_v7 = vadd.f32 %v742_v6, %v1270_v9  ;;  %v1086_v10 = vpop.f32.mrb[7].mxu0  ;;  %v746_v12 = vadd.f32 %v963_v11, %v742_v6 }
0x111f   :  { %755 = vrot.lane.b32.xlu1 %v753_v7, %s1202_s25  ;;  %v965_v13 = vmul.f32 -1.442695, %v746_v12 }
0x1121   :  { %1187 = vpow2.f32 %v965_v13 }
0x112b   :  { %v1188_v14 = vpop.eup %1187 }
0x112c   :  { %v750_v15 = vadd.f32 1.0, %v1188_v14 }
0x112e   :  { %1189 = vrcp.f32 %v750_v15 }
0x1138   :  { %v1190_v16 = vpop.eup %1189 }
0x1139   :  { %v765_v22 = vsub.f32 1.0, %v1190_v16  ;;  %v771_v24 = vmul.f32 %v1190_v16, %v665_v2 }
0x1191   :  { %v756_v17 = vpop.permute.xlu1 %755 }
0x1192   :  { %v758_v18 = vmul.f32 %v1190_v16, %v756_v17 }
0x1194   :  { %760 = vrot.lane.b32.xlu0 %v758_v18, %s1202_s25 }
0x1206   :  { %v761_v19 = vpop.permute.xlu0 %760 }
0x1207   :  { %v763_v20 = vadd.f32 %v963_v11, %v761_v19 }
0x1209   :  { %1191 = vtanh.f32 %v763_v20 }
0x1213   :  { %v1192_v21 = vpop.eup %1191 }
0x1214   :  { %767 = vrot.lane.b32.xlu1 %v1192_v21, %s1203_s26 }
0x1286   :  { %v768_v23 = vpop.permute.xlu1 %767 }
0x1287   :  { %v770_v25 = vmul.f32 %v768_v23, %v765_v22 }
0x1289   :  { %v772_v26 = vadd.f32 %v771_v24, %v770_v25 }
0x128b   :  { %774 = vrot.lane.b32.xlu0 %v772_v26, %s1203_s26 }
0x12fd   :  { %v775_v27 = vpop.permute.xlu0 %774 }
0x12fe   :  { %778 = vst.msk [vmem:[#allocation2 + $0x30] sm:$0xff] %vm28_vm1, %v775_v27  ;;  %1096 = vmatmul.mubr.msk.f32.vlgmr.msra.gmra.mrb[6].mxu1 %vm28_vm1, %v775_v27 }
0x1305   :  { %v892_v60 = vld [vmem:[#allocation2 + $0x30] sm:$0xff] }
0x1306   :  { %v907_v62 = vmul.f32 %v969_v42, %v892_v60 }
0x1308   :  { %v927_v63 = vsel %vm28_vm1, %v907_v62, 0.0 }
0x13d1   :  { %v849_v28 = vpop.f32.mrb[6].mxu1 }
0x13d2   :  { %v860_v29 = vadd.f32 %v849_v28, %v1270_v9  ;;  %v1097_v30 = vpop.f32.mrb[7].mxu1  ;;  %v853_v32 = vadd.f32 %v966_v31, %v849_v28 }
0x13d4   :  { %862 = vrot.lane.b32.xlu1 %v860_v29, %s1202_s25  ;;  %v968_v33 = vmul.f32 -1.442695, %v853_v32 }
0x13d6   :  { %1193 = vpow2.f32 %v968_v33 }
0x13e0   :  { %v1194_v34 = vpop.eup %1193 }
0x13e1   :  { %v857_v35 = vadd.f32 1.0, %v1194_v34 }
0x13e3   :  { %1195 = vrcp.f32 %v857_v35 }
0x13ed   :  { %v1196_v36 = vpop.eup %1195 }
0x13ee   :  { %v872_v51 = vsub.f32 1.0, %v1196_v36  ;;  %v878_v53 = vmul.f32 %v1196_v36, %v772_v26 }
0x1446   :  { %v863_v37 = vpop.permute.xlu1 %862 }
0x1447   :  { %v865_v38 = vmul.f32 %v1196_v36, %v863_v37 }
0x1449   :  { %867 = vrot.lane.b32.xlu0 %v865_v38, %s1202_s25 }
0x14bb   :  { %v868_v39 = vpop.permute.xlu0 %867 }
0x14bc   :  { %v870_v9 = vadd.f32 %v966_v31, %v868_v39 }
0x14be   :  { %1197 = vtanh.f32 %v870_v9 }
0x14c8   :  { %v1198_v40 = vpop.eup %1197 }
0x14c9   :  { %874 = vrot.lane.b32.xlu1 %v1198_v40, %s1203_s26 }
0x14ed   :  { %910 = vadd.xlane.f32.xlu1 %v909_v45 }
0x14f1   :  { %919 = vadd.xlane.f32.xlu1 %v918_v48 }
0x14f5   :  { %925 = vadd.xlane.f32.xlu1 %v924_v50 }
0x153b   :  { %v875_v52 = vpop.permute.xlu1 %874 }
0x153c   :  { %v877_v54 = vmul.f32 %v875_v52, %v872_v51 }
0x153e   :  { %v879_v55 = vadd.f32 %v878_v53, %v877_v54 }
0x1540   :  { %881 = vrot.lane.b32.xlu0 %v879_v55, %s1203_s26 }
0x155f   :  { %913 = vadd.xlane.f32.xlu0 %v912_v4 }
0x1563   :  { %916 = vadd.xlane.f32.xlu0 %v915_v8 }
0x1567   :  { %922 = vadd.xlane.f32.xlu0 %v921_v61 }
0x156b   :  { %928 = vadd.xlane.f32.xlu0 %v927_v63 }
0x157a   :  { %v911_v1 = vpop.xlane.xlu1 %910 }
0x157b   :  { %934 = vst.msk [vmem:[%s1426_s4] sm:$0xff] %vm933_vm2, %v911_v1 }
0x157e   :  { %v920_v2 = vpop.xlane.xlu1 %919 }
0x157f   :  { %937 = vst.msk [vmem:[%s1426_s4 + $0x18] sm:$0xff] %vm933_vm2, %v920_v2 }
0x1582   :  { %v926_v3 = vpop.xlane.xlu1 %925 }
0x1583   :  { %939 = vst.msk [vmem:[%s1426_s4 + $0x28] sm:$0xff] %vm933_vm2, %v926_v3 }
0x15b2   :  { %v882_v6 = vpop.permute.xlu0 %881 }
0x15b3   :  { %885 = vst.msk [vmem:[#allocation2 + $0x38] sm:$0xff] %vm28_vm1, %v882_v6 }
0x15ba   :  { %v893_v7 = vld [vmem:[#allocation2 + $0x38] sm:$0xff] }
0x15bb   :  { %v908_v10 = vmul.f32 %v969_v42, %v893_v7 }
0x15bd   :  { %v930_v11 = vsel %vm28_vm1, %v908_v10, 0.0 }
0x15be   :  { %931 = vadd.xlane.f32.xlu1 %v930_v11 }
0x15ec   :  { %v914_v12 = vpop.xlane.xlu0 %913 }
0x15ed   :  { %935 = vst.msk [vmem:[%s1426_s4 + $0x8] sm:$0xff] %vm933_vm2, %v914_v12 }
0x15f0   :  { %v917_v13 = vpop.xlane.xlu0 %916 }
0x15f1   :  { %936 = vst.msk [vmem:[%s1426_s4 + $0x10] sm:$0xff] %vm933_vm2, %v917_v13 }
0x15f4   :  { %v923_v14 = vpop.xlane.xlu0 %922 }
0x15f5   :  { %938 = vst.msk [vmem:[%s1426_s4 + $0x20] sm:$0xff] %vm933_vm2, %v923_v14 }
0x15f8   :  { %v929_v15 = vpop.xlane.xlu0 %928 }
0x15f9   :  { %940 = vst.msk [vmem:[%s1426_s4 + $0x30] sm:$0xff] %vm933_vm2, %v929_v15 }
0x164b   :  { %v932_v16 = vpop.xlane.xlu1 %931 }
0x164c   :  { %941 = vst.msk [vmem:[%s1426_s4 + $0x38] sm:$0xff] %vm933_vm2, %v932_v16 }

</bundles_post_ra>
